<compile_context>
chip_gen: v6e
topology: v6e:2x2x1
jax: 0.10.0
libtpu: 0.0.40
codegen_flags: <defaults>
</compile_context>

<pallas_src>
import numpy as np
import jax
import jax.numpy as jnp
from jax.experimental import pallas as pl
from jax.experimental.pallas import tpu as pltpu


def _round_up(x, m):
    return ((x + m - 1) // m) * m


def _make_mask_count_kernel(metric, ignore_query_point):
    """Fused kernel: (tq, tn) tile of within-radius int8 mask + per-query int32 counts."""

    def kernel(thresh_ref, q_ref, pt_ref, mask_ref, cnt_ref):
        j = pl.program_id(1)

        @pl.when(j == 0)
        def _():
            cnt_ref[...] = jnp.zeros_like(cnt_ref)

        thr = thresh_ref[0]                   # radius (or radius^2 for L2), SMEM scalar
        q = q_ref[...]                        # (tq, 3)
        acc = None
        for c in range(3):                    # static unrolled xyz loop; pure VPU work
            qc = q[:, c:c + 1]                # (tq, 1)
            pc = pt_ref[c:c + 1, :]           # (1, tn)
            diff = qc - pc                    # (tq, tn) broadcast
            if metric == 'L2':
                term = diff * diff            # squared L2 (open3d returns squared dists)
            else:
                term = jnp.abs(diff)
            if acc is None:
                acc = term
            elif metric == 'Linf':
                acc = jnp.maximum(acc, term)
            else:                             # L1 or L2
                acc = acc + term

        inside = acc <= thr
        if ignore_query_point:
            # TODO(synk): open3d excludes by index identity; dist>0 also drops exact duplicates.
            inside = inside & (acc > 0.0)

        mask_ref[...] = inside.astype(jnp.int8)                              # lane-dense int8 slab
        cnt_ref[...] += jnp.sum(inside.astype(jnp.int32), axis=1, keepdims=True)

    return kernel


def _radius_mask_and_counts(queries, points, thresh, metric, ignore_query_point,
                            tq_cap=256, tn_cap=2048):
    """Returns (mask int8 [Q,N], counts int32 [Q]) computed on TPU via Pallas."""
    Q = queries.shape[0]
    N = points.shape[0]
    # int8 output tiling wants sublane multiple of 32 and lane multiple of 128.
    tq = min(tq_cap, _round_up(Q, 32))
    tn = min(tn_cap, _round_up(N, 128))
    Qp = _round_up(Q, tq)
    Np = _round_up(N, tn)

    q_pad = jnp.pad(queries.astype(jnp.float32), ((0, Qp - Q), (0, 0)))
    # pad points far away so padded columns never fall inside any sane radius
    p_pad = jnp.pad(points.astype(jnp.float32), ((0, Np - N), (0, 0)),
                    constant_values=1e9)
    pt = p_pad.T                                           # (3, Np): point axis on the lanes
    thr_arr = jnp.asarray([thresh], dtype=jnp.float32)

    mask, counts = pl.pallas_call(
        _make_mask_count_kernel(metric, ignore_query_point),
        out_shape=(jax.ShapeDtypeStruct((Qp, Np), jnp.int8),
                   jax.ShapeDtypeStruct((Qp, 1), jnp.int32)),
        grid=(Qp // tq, Np // tn),
        in_specs=[
            pl.BlockSpec(memory_space=pltpu.MemorySpace.SMEM),   # radius threshold scalar
            pl.BlockSpec((tq, 3), lambda i, j: (i, 0)),          # query tile
            pl.BlockSpec((3, tn), lambda i, j: (0, j)),          # transposed point tile
        ],
        out_specs=(
            pl.BlockSpec((tq, tn), lambda i, j: (i, j)),         # int8 mask tile
            pl.BlockSpec((tq, 1), lambda i, j: (i, 0)),          # count accumulator (resident over j)
        ),
        compiler_params=pltpu.CompilerParams(
            dimension_semantics=("parallel", "arbitrary"),
            vmem_limit_bytes=32 * 1024 * 1024),
    )(thr_arr, q_pad, pt)

    return mask[:Q, :N], counts[:Q, 0]


class FixedRadiusSearch:
    """JAX/Pallas port of open3d.ml.torch.layers.FixedRadiusSearch.

    No learnable parameters.  The spatial hash table of the original op is only an acceleration
    structure; the semantics are identical to brute-force radius search, which is what we compute.
    """

    def __init__(self, metric='L2', ignore_query_point=False,
                 return_distances=False, max_hash_table_size=32 * 2 ** 20,
                 index_dtype=jnp.int32, **kwargs):
        assert metric in ('L1', 'L2', 'Linf')
        assert index_dtype in (jnp.int32, jnp.int64)
        self.metric = metric
        self.ignore_query_point = ignore_query_point
        self.return_distances = return_distances
        self.max_hash_table_size = max_hash_table_size  # unused (no hash table needed)
        self.index_dtype = index_dtype

    def __call__(self, points, queries, radius,
                 points_row_splits=None, queries_row_splits=None,
                 hash_table_size_factor=1 / 64, hash_table=None):
        # TODO(synk): batched (row_splits) inputs are treated as a single batch item here.
        points = jnp.asarray(points, jnp.float32)
        queries = jnp.asarray(queries, jnp.float32)
        thresh = float(radius) ** 2 if self.metric == 'L2' else float(radius)

        mask, counts = _radius_mask_and_counts(
            queries, points, thresh, self.metric, self.ignore_query_point)

        # Row splits fully on device (int32), widened to int64 on host at the end.
        row_splits_i32 = jnp.concatenate(
            [jnp.zeros((1,), jnp.int32), jnp.cumsum(counts, dtype=jnp.int32)])
        row_splits = np.asarray(row_splits_i32).astype(np.int64)

        # Ragged compaction (data-dependent output length): only the int8 mask crosses PCIe.
        mask_np = np.asarray(mask)                       # Q*N bytes, int8
        q_idx, p_idx = np.nonzero(mask_np)               # row-major => grouped by query, ascending
        if self.index_dtype == jnp.int32:
            neighbors_index = jnp.asarray(p_idx.astype(np.int32))
        else:
            neighbors_index = p_idx.astype(np.int64)     # keep 64-bit width without global x64

        if self.return_distances and p_idx.size > 0:
            # Device-side gather + per-pair distance: O(K) work, no dense f32 matrix in HBM.
            qi = jnp.asarray(q_idx.astype(np.int32))
            pi = jnp.asarray(p_idx.astype(np.int32))
            diff = jnp.take(queries, qi, axis=0) - jnp.take(points, pi, axis=0)
            if self.metric == 'L2':
                neighbors_distance = jnp.sum(diff * diff, axis=-1)
            elif self.metric == 'L1':
                neighbors_distance = jnp.sum(jnp.abs(diff), axis=-1)
            else:
                neighbors_distance = jnp.max(jnp.abs(diff), axis=-1)
            neighbors_distance = neighbors_distance.astype(jnp.float32)
        else:
            neighbors_distance = jnp.zeros((0,), dtype=jnp.float32)

        return neighbors_index, row_splits, neighbors_distance


def _reference(points, queries, radius, metric, ignore_query_point):
    """Pure-numpy reference for validation."""
    p = np.asarray(points, np.float64)
    q = np.asarray(queries, np.float64)
    diff = q[:, None, :] - p[None, :, :]
    if metric == 'L2':
        d = np.sum(diff * diff, axis=-1)
        thr = radius * radius
    elif metric == 'L1':
        d = np.sum(np.abs(diff), axis=-1)
        thr = radius
    else:
        d = np.max(np.abs(diff), axis=-1)
        thr = radius
    m = d <= thr
    if ignore_query_point:
        m &= d > 0
    qi, pi = np.nonzero(m)
    counts = m.sum(axis=1)
    rs = np.concatenate([[0], np.cumsum(counts)]).astype(np.int64)
    return pi.astype(np.int32), rs, d[qi, pi].astype(np.float32)


if __name__ == "__main__":
    key = jax.random.PRNGKey(0)
    kp, kq = jax.random.split(key)
    points = jax.random.normal(kp, (20, 3), dtype=jnp.float32)
    queries = jax.random.normal(kq, (10, 3), dtype=jnp.float32)
    radius = 0.8

    nsearch = FixedRadiusSearch(metric='L2', return_distances=True)
    nidx, rsplits, ndist = nsearch(points, queries, radius)
    jax.block_until_ready((nidx, ndist))

    # validate against numpy reference
    ref_idx, ref_rs, ref_d = _reference(points, queries, radius, 'L2', False)
    assert np.array_equal(np.asarray(nidx), ref_idx), "neighbor indices mismatch"
    assert np.array_equal(np.asarray(rsplits), ref_rs), "row splits mismatch"
    assert np.allclose(np.asarray(ndist), ref_d, atol=1e-5), "distances mismatch"

    print("KERNEL_OK")
</pallas_src>

<mosaic_0001>
module attributes {stable_mosaic.version = 11 : i64} {
  func.func @kernel(%arg0: i32, %arg1: i32, %arg2: memref<1xf32, #tpu.memory_space<smem>>, %arg3: memref<32x3xf32, #tpu.memory_space<vmem>>, %arg4: memref<3x128xf32, #tpu.memory_space<vmem>>, %arg5: memref<32x128xi8, #tpu.memory_space<vmem>>, %arg6: memref<32x1xi32, #tpu.memory_space<vmem>>) attributes {dimension_semantics = [#tpu.dimension_semantics<parallel>, #tpu.dimension_semantics<arbitrary>], iteration_bounds = array<i64: 1, 1>, scalar_prefetch = 0 : i64, scratch_operands = 0 : i64, tpu.core_type = #tpu.core_type<tc>, window_params = [{transform_indices = @transform_0, window_bounds = array<i64: 1>}, {transform_indices = @transform_1, window_bounds = array<i64: 32, 3>}, {transform_indices = @transform_2, window_bounds = array<i64: 3, 128>}, {transform_indices = @transform_3, window_bounds = array<i64: 32, 128>}, {transform_indices = @transform_4, window_bounds = array<i64: 32, 1>}]} {
    %c0_i32 = arith.constant 0 : i32
    %0 = arith.cmpi eq, %arg1, %c0_i32 : i32
    %1 = arith.extui %0 : i1 to i32
    %c0_i32_0 = arith.constant 0 : i32
    %2 = arith.cmpi ne, %1, %c0_i32_0 : i32
    scf.if %2 {
      %c0_i32_13 = arith.constant 0 : i32
      %35 = vector.broadcast %c0_i32_13 : i32 to vector<32x1xi32>
      %c0_14 = arith.constant 0 : index
      %c0_15 = arith.constant 0 : index
      %36 = vector.load %arg6[%c0_14, %c0_15] : memref<32x1xi32, #tpu.memory_space<vmem>>, vector<32x1xi32>
      tpu.vector_store %arg6[%c0_14, %c0_15], %35 {strides = array<i32>} : memref<32x1xi32, #tpu.memory_space<vmem>>, vector<32x1xi32>,
    } else {
    }
    %c0 = arith.constant 0 : index
    %3 = memref.load %arg2[%c0] : memref<1xf32, #tpu.memory_space<smem>>
    %c0_1 = arith.constant 0 : index
    %c0_2 = arith.constant 0 : index
    %4 = vector.load %arg3[%c0_1, %c0_2] : memref<32x3xf32, #tpu.memory_space<vmem>>, vector<32x3xf32>
    %5 = vector.extract_strided_slice %4 {offsets = [0, 0], sizes = [32, 1], strides = [1, 1]} : vector<32x3xf32> to vector<32x1xf32>
    %c0_3 = arith.constant 0 : index
    %c0_4 = arith.constant 0 : index
    %6 = vector.load %arg4[%c0_3, %c0_4] : memref<3x128xf32, #tpu.memory_space<vmem>>, vector<1x128xf32>
    %7 = vector.broadcast %5 : vector<32x1xf32> to vector<32x128xf32>
    %8 = vector.broadcast %6 : vector<1x128xf32> to vector<32x128xf32>
    %9 = arith.subf %7, %8 : vector<32x128xf32>
    %10 = arith.mulf %9, %9 : vector<32x128xf32>
    %11 = vector.extract_strided_slice %4 {offsets = [0, 1], sizes = [32, 1], strides = [1, 1]} : vector<32x3xf32> to vector<32x1xf32>
    %c1 = arith.constant 1 : index
    %c0_5 = arith.constant 0 : index
    %12 = vector.load %arg4[%c1, %c0_5] : memref<3x128xf32, #tpu.memory_space<vmem>>, vector<1x128xf32>
    %13 = vector.broadcast %11 : vector<32x1xf32> to vector<32x128xf32>
    %14 = vector.broadcast %12 : vector<1x128xf32> to vector<32x128xf32>
    %15 = arith.subf %13, %14 : vector<32x128xf32>
    %16 = arith.mulf %15, %15 : vector<32x128xf32>
    %17 = arith.addf %10, %16 : vector<32x128xf32>
    %18 = vector.extract_strided_slice %4 {offsets = [0, 2], sizes = [32, 1], strides = [1, 1]} : vector<32x3xf32> to vector<32x1xf32>
    %c2 = arith.constant 2 : index
    %c0_6 = arith.constant 0 : index
    %19 = vector.load %arg4[%c2, %c0_6] : memref<3x128xf32, #tpu.memory_space<vmem>>, vector<1x128xf32>
    %20 = vector.broadcast %18 : vector<32x1xf32> to vector<32x128xf32>
    %21 = vector.broadcast %19 : vector<1x128xf32> to vector<32x128xf32>
    %22 = arith.subf %20, %21 : vector<32x128xf32>
    %23 = arith.mulf %22, %22 : vector<32x128xf32>
    %24 = arith.addf %17, %23 : vector<32x128xf32>
    %25 = vector.broadcast %3 : f32 to vector<32x128xf32>
    %26 = arith.cmpf ole, %24, %25 : vector<32x128xf32>
    %27 = arith.extui %26 : vector<32x128xi1> to vector<32x128xi8>
    %c0_7 = arith.constant 0 : index
    %c0_8 = arith.constant 0 : index
    %28 = vector.load %arg5[%c0_7, %c0_8] : memref<32x128xi8, #tpu.memory_space<vmem>>, vector<32x128xi8>
    tpu.vector_store %arg5[%c0_7, %c0_8], %27 {strides = array<i32>} : memref<32x128xi8, #tpu.memory_space<vmem>>, vector<32x128xi8>,
    %c0_9 = arith.constant 0 : index
    %c0_10 = arith.constant 0 : index
    %29 = vector.load %arg6[%c0_9, %c0_10] : memref<32x1xi32, #tpu.memory_space<vmem>>, vector<32x1xi32>
    %30 = arith.extui %26 : vector<32x128xi1> to vector<32x128xi32>
    %cst = arith.constant dense<0> : vector<32xi32>
    %31 = vector.multi_reduction <add>, %30, %cst [1] : vector<32x128xi32> to vector<32xi32>
    %32 = vector.shape_cast %31 : vector<32xi32> to vector<32x1xi32>
    %33 = arith.addi %29, %32 : vector<32x1xi32>
    %c0_11 = arith.constant 0 : index
    %c0_12 = arith.constant 0 : index
    %34 = vector.load %arg6[%c0_11, %c0_12] : memref<32x1xi32, #tpu.memory_space<vmem>>, vector<32x1xi32>
    tpu.vector_store %arg6[%c0_11, %c0_12], %33 {strides = array<i32>} : memref<32x1xi32, #tpu.memory_space<vmem>>, vector<32x1xi32>,
    return
  }
  func.func @transform_0(%arg0: i32, %arg1: i32) -> i32 {
    %c0_i32 = arith.constant 0 : i32
    %c0_i32_0 = arith.constant 0 : i32
    return %c0_i32 : i32
  }
  func.func @transform_1(%arg0: i32, %arg1: i32) -> (i32, i32) {
    %c0_i32 = arith.constant 0 : i32
    %c0_i32_0 = arith.constant 0 : i32
    return %arg0, %c0_i32 : i32, i32
  }
  func.func @transform_2(%arg0: i32, %arg1: i32) -> (i32, i32) {
    %c0_i32 = arith.constant 0 : i32
    %c0_i32_0 = arith.constant 0 : i32
    return %c0_i32, %arg1 : i32, i32
  }
  func.func @transform_3(%arg0: i32, %arg1: i32) -> (i32, i32) {
    %c0_i32 = arith.constant 0 : i32
    return %arg0, %arg1 : i32, i32
  }
  func.func @transform_4(%arg0: i32, %arg1: i32) -> (i32, i32) {
    %c0_i32 = arith.constant 0 : i32
    %c0_i32_0 = arith.constant 0 : i32
    return %arg0, %c0_i32 : i32, i32
  }
}

</mosaic_0001>

<bundles_post_ra>
// kernel: tpu_custom_call.1
= control target key start
LH: loop header
LB: loop body
LE: loop exit
PB: predicated region body
PF: predicated region fallthrough
CT: control target
= control target key end

     0   :  { %v261_v2 = vmov 0   ;;  %s376_s0 = inlined_call_operand.<no memory space> [shape: f32[1], index: 0, kind: input, shape index: {}]   ;;  %s377_s1 = inlined_call_operand.vmem [shape: f32[32,3], index: 1, kind: input, shape index: {}]   ;;  %s378_s2 = inlined_call_operand.vmem [shape: f32[3,128], index: 2, kind: input, shape index: {}]   ;;  %s379_s3 = inlined_call_operand.hbm [shape: s8[32,128], index: 3, kind: output, shape index: {0}]   ;;  %s380_s4 = inlined_call_operand.vmem [shape: s32[32,1], index: 4, kind: output, shape index: {1}]  }
   0x1   :  { %v32_v0 = vld [vmem:[%s377_s1 + $0x10] sm:$0xff]  ;;  %v30_v1 = vld [vmem:[%s377_s1] sm:$0xff]  ;;  %234 = vset.pattern.permute.xlu1 %v261_v2  ;;  %233 = vset.pattern.permute.xlu0 %v261_v2 }
   0x2   :  { %11 = vsyncpa [#allocation4], 0  ;;  %47 = vperm.xlu1 %234, %v32_v0   ;;  %37 = vperm.xlu0 %233, %v30_v1   ;;  %v33_v3 = vld [vmem:[%s377_s1 + $0x18] sm:$0xff]  ;;  %v31_v4 = vld [vmem:[%s377_s1 + $0x8] sm:$0xff]  ;;  %v262_v5 = vmov 1   ;;  %v263_v6 = vmov 2   ;;  %v133_v40 = vstv %s376_s0 }
   0x3   :  { %v227_v11 = vld [vmem:[%s378_s2 + $0x1] ss:$0 sm:$0xff]  ;;  %v226_v15 = vld [vmem:[%s378_s2] ss:$0 sm:$0xff]  ;;  %v228_v22 = vld [vmem:[%s378_s2 + $0x2] ss:$0 sm:$0xff] }
   0x4   :  { %vm24_vm7 = vcmask 7168   ;;  %s264_s10 = smov [#allocation3]  }
   0x5   :  { %25 = vst.msk [vmem:[%s380_s4] sm:$0xff] %vm24_vm7, %v261_v2  ;;  %26 = vst.msk [vmem:[%s380_s4 + $0x8] sm:$0xff] %vm24_vm7, %v261_v2  ;;  %s214_s11 = sshll.u32 %s264_s10, 4  ;;  %s215_s11 = int_to_ptr.vmem [resolvable:$true] %s214_s11 }
   0x6   :  { %52 = vperm.xlu1 %234, %v33_v3   ;;  %42 = vperm.xlu0 %233, %v31_v4   ;;  %27 = vst.msk [vmem:[%s380_s4 + $0x10] sm:$0xff] %vm24_vm7, %v261_v2  ;;  %28 = vst.msk [vmem:[%s380_s4 + $0x18] sm:$0xff] %vm24_vm7, %v261_v2  ;;  %s239_s12 = scalar_lea.vmem %s215_s11, 128  ;;  %p244_p1 = scmp.lt.s32.totalorder %s215_s11, %s215_s11 }
   0x7   :  { %p240_p0 = scmp.ne.s32.totalorder %s215_s11, %s239_s12  ;;  %p245_p2 = scmp.lt.s32.totalorder %s239_s12, %s239_s12 }
   0x9   :  { %p246_p3 = por %p245_p2, %p244_p1 }
   0xa   :  { %236 = vset.pattern.permute.xlu1 %v262_v5  ;;  %235 = vset.pattern.permute.xlu0 %v262_v5 }
   0xb   :  { %73 = vperm.xlu1 %236, %v31_v4   ;;  %69 = vperm.xlu0 %235, %v30_v1   ;;  %p247_p4 = pnand %p246_p3, %p240_p0 }
   0xf   :  { %77 = vperm.xlu1 %236, %v32_v0   ;;  %81 = vperm.xlu0 %235, %v33_v3  }
  0x13   :  { %237 = vset.pattern.permute.xlu1 %v263_v6  ;;  %238 = vset.pattern.permute.xlu0 %v263_v6 }
  0x14   :  { %102 = vperm.xlu1 %237, %v30_v1   ;;  %106 = vperm.xlu0 %238, %v31_v4  }
  0x18   :  { %110 = vperm.xlu1 %237, %v32_v0  }
  0x1c   :  { %114 = vperm.xlu1 %237, %v33_v3  }
  0x7d   :  { %v48_v7 = vpop.permute.xlu1 %47  ;;  %v38_v8 = vpop.permute.xlu0 %37 }
  0x7e   :  { %v59_v20 = vsub.f32 %v38_v8, %v226_v15  ;;  %v61_v28 = vsub.f32 %v48_v7, %v226_v15 }
  0x80   :  { %v63_v29 = vmul.f32 %v59_v20, %v59_v20  ;;  %v65_v41 = vmul.f32 %v61_v28, %v61_v28 }
  0x81   :  { %v53_v9 = vpop.permute.xlu1 %52  ;;  %v43_v10 = vpop.permute.xlu0 %42 }
  0x82   :  { %v60_v19 = vsub.f32 %v43_v10, %v226_v15  ;;  %v62_v38 = vsub.f32 %v53_v9, %v226_v15 }
  0x84   :  { %v64_v25 = vmul.f32 %v60_v19, %v60_v19  ;;  %v66_v48 = vmul.f32 %v62_v38, %v62_v38 }
  0x86   :  { %v74_v12 = vpop.permute.xlu1 %73  ;;  %v70_v13 = vpop.permute.xlu0 %69 }
  0x87   :  { %v89_v14 = vsub.f32 %v74_v12, %v227_v11  ;;  %v88_v16 = vsub.f32 %v70_v13, %v227_v11 }
  0x89   :  { %v93_v21 = vmul.f32 %v89_v14, %v89_v14  ;;  %v92_v23 = vmul.f32 %v88_v16, %v88_v16 }
  0x8a   :  { %v78_v17 = vpop.permute.xlu1 %77  ;;  %v82_v18 = vpop.permute.xlu0 %81 }
  0x8b   :  { %v90_v24 = vsub.f32 %v78_v17, %v227_v11  ;;  %v97_v32 = vadd.f32 %v93_v21, %v64_v25  ;;  %v91_v33 = vsub.f32 %v82_v18, %v227_v11  ;;  %v96_v34 = vadd.f32 %v92_v23, %v63_v29 }
  0x8d   :  { %v94_v35 = vmul.f32 %v90_v24, %v90_v24  ;;  %v95_v45 = vmul.f32 %v91_v33, %v91_v33 }
  0x8f   :  { %v103_v26 = vpop.permute.xlu1 %102  ;;  %v107_v27 = vpop.permute.xlu0 %106  ;;  %v98_v46 = vadd.f32 %v94_v35, %v65_v41  ;;  %v99_v56 = vadd.f32 %v95_v45, %v66_v48 }
  0x90   :  { %v121_v30 = vsub.f32 %v103_v26, %v228_v22  ;;  %v122_v31 = vsub.f32 %v107_v27, %v228_v22 }
  0x92   :  { %v125_v36 = vmul.f32 %v121_v30, %v121_v30  ;;  %v126_v37 = vmul.f32 %v122_v31, %v122_v31 }
  0x93   :  { %v111_v39 = vpop.permute.xlu1 %110 }
  0x94   :  { %v129_v42 = vadd.f32 %v125_v36, %v96_v34  ;;  %v130_v43 = vadd.f32 %v126_v37, %v97_v32  ;;  %v123_v44 = vsub.f32 %v111_v39, %v228_v22 }
  0x96   :  { %v127_v47 = vmul.f32 %v123_v44, %v123_v44  ;;  %vm134_vm0 = vcmp.le.f32.partialorder %v129_v42, %v133_v40  ;;  %vm135_vm1 = vcmp.le.f32.partialorder %v130_v43, %v133_v40 }
  0x97   :  { %v115_v49 = vpop.permute.xlu1 %114  ;;  %v147_v50 = vsel %vm134_vm0, 1, %v261_v2  ;;  %v148_v51 = vsel %vm135_vm1, 1, %v261_v2  ;;  %vm138_vm4 = vmpackc.low %vm135_vm1, %vm134_vm0 }
  0x98   :  { %v131_v52 = vadd.f32 %v127_v47, %v98_v46  ;;  %v124_v53 = vsub.f32 %v115_v49, %v228_v22  ;;  %v152_v54 = vshrl.u32 %v147_v50, 16  ;;  %v164_v55 = vshrl.u32 %v148_v51, 16 }
  0x99   :  { %v151_v57 = vand.u32 65535, %v147_v50  ;;  %v163_v9 = vand.u32 65535, %v148_v51 }
  0x9a   :  { %v128_v58 = vmul.f32 %v124_v53, %v124_v53  ;;  %v154_v59 = vcvt.s32.f32 %v152_v54  ;;  %v166_v60 = vcvt.s32.f32 %v164_v55  ;;  %vm136_vm2 = vcmp.le.f32.partialorder %v131_v52, %v133_v40 }
  0x9b   :  { %v149_v61 = vsel %vm136_vm2, 1, %v261_v2  ;;  %v153_v1 = vcvt.s32.f32 %v151_v57  ;;  %v165_v10 = vcvt.s32.f32 %v163_v9 }
  0x9c   :  { %v132_v62 = vadd.f32 %v128_v58, %v99_v56  ;;  %157 = vadd.xlane.f32.xlu0 %v154_v59  ;;  %169 = vadd.xlane.f32.xlu1 %v166_v60  ;;  %v176_v63 = vshrl.u32 %v149_v61, 16  ;;  %v175_v3 = vand.u32 65535, %v149_v61 }
  0x9e   :  { %v178_v0 = vcvt.s32.f32 %v176_v63  ;;  %vm137_vm3 = vcmp.le.f32.partialorder %v132_v62, %v133_v40  ;;  %v177_v8 = vcvt.s32.f32 %v175_v3 }
  0x9f   :  { %v150_v4 = vsel %vm137_vm3, 1, %v261_v2  ;;  %vm139_vm5 = vmpackc.low %vm137_vm3, %vm136_vm2 }
  0xa0   :  { %181 = vadd.xlane.f32.xlu0 %v178_v0  ;;  %155 = vadd.xlane.f32.xlu1 %v153_v1  ;;  %v188_v5 = vshrl.u32 %v150_v4, 16  ;;  %vm140_vm6 = vmpackc.even %vm139_vm5, %vm138_vm4  ;;  %v187_v11 = vand.u32 65535, %v150_v4 }
  0xa1   :  { %v141_v6 = vsel %vm140_vm6, 16843009, %v261_v2 }
  0xa2   :  { %v190_v7 = vcvt.s32.f32 %v188_v5  ;;  %142 = vst [vmem:[#allocation3] sm:$0xff] %v141_v6  ;;  %v189_v12 = vcvt.s32.f32 %v187_v11 }
  0xa4   :  { %193 = vadd.xlane.f32.xlu0 %v190_v7  ;;  %179 = vadd.xlane.f32.xlu1 %v177_v8 }
  0xa8   :  { %167 = vadd.xlane.f32.xlu0 %v165_v10 }
  0xac   :  { %191 = vadd.xlane.f32.xlu0 %v189_v12 }
  0xad   :  { %250 = shalt.err (!%p247_p4)
}
  0xae   :  { %217 = dma.vmem_to_hbm [thread:$0]  %s215_s11, 128, %s379_s3, [#allocation4]   ;;  %v143_v20 = vld [vmem:[%s380_s4] sm:$0xff]  ;;  %v145_v28 = vld [vmem:[%s380_s4 + $0x10] sm:$0xff]  ;;  %v144_v35 = vld [vmem:[%s380_s4 + $0x8] sm:$0xff] }
  0xaf   :  { %v146_v41 = vld [vmem:[%s380_s4 + $0x18] sm:$0xff] }
 0x125   :  { %v170_v13 = vpop.xlane.xlu1 %169  ;;  %v158_v14 = vpop.xlane.xlu0 %157 }
 0x126   :  { %v160_v2 = vcvt.f32.s32 %v158_v14  ;;  %v172_v24 = vcvt.f32.s32 %v170_v13 }
 0x128   :  { %v161_v17 = vshll.u32 %v160_v2, 16  ;;  %v173_v31 = vshll.u32 %v172_v24, 16 }
 0x129   :  { %v156_v15 = vpop.xlane.xlu1 %155  ;;  %v182_v16 = vpop.xlane.xlu0 %181 }
 0x12a   :  { %v159_v18 = vcvt.f32.s32 %v156_v15  ;;  %v184_v19 = vcvt.f32.s32 %v182_v16 }
 0x12c   :  { %v162_v21 = vadd.s32 %v161_v17, %v159_v18  ;;  %v185_v26 = vshll.u32 %v184_v19, 16 }
 0x12d   :  { %v180_v22 = vpop.xlane.xlu1 %179  ;;  %v194_v23 = vpop.xlane.xlu0 %193 }
 0x12e   :  { %v199_v25 = vadd.s32 %v162_v21, %v143_v20  ;;  %v183_v27 = vcvt.f32.s32 %v180_v22  ;;  %v196_v33 = vcvt.f32.s32 %v194_v23 }
 0x130   :  { %204 = vst.msk [vmem:[%s380_s4] sm:$0xff] %vm24_vm7, %v199_v25  ;;  %v186_v29 = vadd.s32 %v185_v26, %v183_v27  ;;  %v197_v38 = vshll.u32 %v196_v33, 16 }
 0x131   :  { %v168_v30 = vpop.xlane.xlu0 %167 }
 0x132   :  { %v201_v32 = vadd.s32 %v186_v29, %v145_v28  ;;  %v171_v34 = vcvt.f32.s32 %v168_v30 }
 0x134   :  { %206 = vst.msk [vmem:[%s380_s4 + $0x10] sm:$0xff] %vm24_vm7, %v201_v32  ;;  %v174_v36 = vadd.s32 %v173_v31, %v171_v34 }
 0x135   :  { %v192_v37 = vpop.xlane.xlu0 %191 }
 0x136   :  { %v200_v39 = vadd.s32 %v174_v36, %v144_v35  ;;  %v195_v40 = vcvt.f32.s32 %v192_v37 }
 0x138   :  { %205 = vst.msk [vmem:[%s380_s4 + $0x8] sm:$0xff] %vm24_vm7, %v200_v39  ;;  %v198_v42 = vadd.s32 %v197_v38, %v195_v40 }
 0x13a   :  { %v202_v43 = vadd.s32 %v198_v42, %v146_v41 }
 0x13c   :  { %207 = vst.msk [vmem:[%s380_s4 + $0x18] sm:$0xff] %vm24_vm7, %v202_v43 }
 0x13d   :  { %259 = dma.done.wait [#allocation4], 128  }
 0x13e   :  { %260 = vsyncadd [#allocation4], 4294967168 }
 0x13f   :  { %225 = vsyncpa [#allocation4], 1 }

</bundles_post_ra>
